<compile_context>
chip_gen: v7x
topology: tpu7x:2x2x1
jax: 0.10.0
libtpu: 0.0.40
codegen_flags: <defaults>
</compile_context>

<pallas_src>
import jax
import jax.numpy as jnp
from jax.experimental import pallas as pl
from jax.experimental.pallas import tpu as pltpu

CLAMP_MIN = 1e-8
CLAMP_MAX = 1e8
LAMADA = 0.5

_LANES = 128
_SUBLANES = 8
# 8192 rows * 128 lanes * 4 B = 4 MiB per input tile; 2 inputs x 2 pipeline
# buffers = 16 MiB.  Scoped-VMEM limit is raised explicitly to 32 MiB so the
# bigger tiles also compile on v5e (16 MiB default) and stay well under
# v7x's 64 MiB physical VMEM per TensorCore.
_MAX_BLOCK_ROWS = 8192
_VMEM_LIMIT_BYTES = 32 * 1024 * 1024
# Leading "parallel" grid axis: 2 TensorCores on v7x; on v5e/v6e it is just
# a harmless sequential outer loop of 2.
_NUM_CORE_GROUPS = 2


def _make_sie_kernel(rows, block_rows, blocks_per_core, full_blocks, any_masked):
    """All arguments are Python ints baked in at trace time."""

    def kernel(yt_ref, yp_ref, sumd_ref, sumd2_ref):
        c = pl.program_id(0)   # core-group axis ("parallel")
        i = pl.program_id(1)   # row-block within the core-group ("arbitrary")

        @pl.when(i == 0)
        def _():
            sumd_ref[...] = jnp.zeros_like(sumd_ref)
            sumd2_ref[...] = jnp.zeros_like(sumd2_ref)

        yt = jnp.clip(yt_ref[...].astype(jnp.float32), CLAMP_MIN, CLAMP_MAX)
        yp = jnp.clip(yp_ref[...].astype(jnp.float32), CLAMP_MIN, CLAMP_MAX)
        # Two EUP logs instead of log(yp / yt): the exact f32 divide lowers to
        # an EUP reciprocal *plus* a VALU Newton-refinement chain, while the
        # EUP slot has slack here.  Also matches the reference expression.
        d = jnp.log(yp) - jnp.log(yt)

        if block_rows % _SUBLANES == 0:
            # Collapse to one (8, 128) vreg with pure VPU adds (no XLU
            # sublane reduce, no masked sublane store) and accumulate into
            # the full VMEM-resident per-core output block.
            grp = (block_rows // _SUBLANES, _SUBLANES, _LANES)

            def _accumulate(dv):
                sumd_ref[...] += jnp.sum(dv.reshape(grp), axis=0)
                sumd2_ref[...] += jnp.sum((dv * dv).reshape(grp), axis=0)
        else:
            # Small single-block case where rows is not a multiple of 8.
            def _accumulate(dv):
                sumd_ref[pl.ds(0, 1), :] += jnp.sum(dv, axis=0, keepdims=True)
                sumd2_ref[pl.ds(0, 1), :] += jnp.sum(dv * dv, axis=0, keepdims=True)

        if not any_masked:
            # Grid tiles the slab exactly: no masking anywhere (static).
            _accumulate(d)
        else:
            gb = c * blocks_per_core + i  # logical (unclamped) block index

            @pl.when(gb < full_blocks)
            def _():
                _accumulate(d)

            @pl.when(gb >= full_blocks)
            def _():
                # Ragged last block (and any over-scheduled block, whose DMA
                # was clamped back onto the last valid block): zero the rows
                # past the end of the slab.  Must stay a true select so
                # NaN/Inf garbage is discarded rather than multiplied.
                row_ids = gb * block_rows + jax.lax.broadcasted_iota(
                    jnp.int32, (block_rows, _LANES), 0
                )
                _accumulate(jnp.where(row_ids < rows, d, 0.0))

    return kernel


def _partial_sums(yt2d, yp2d):
    """Run the Pallas kernel on a (rows, 128) slab; returns (sum_d, sum_d2)."""
    rows = yt2d.shape[0]
    block_rows = rows if rows <= _MAX_BLOCK_ROWS else _MAX_BLOCK_ROWS

    blocks_total = pl.cdiv(rows, block_rows)
    num_core_groups = _NUM_CORE_GROUPS if blocks_total >= _NUM_CORE_GROUPS else 1
    blocks_per_core = pl.cdiv(blocks_total, num_core_groups)
    scheduled = num_core_groups * blocks_per_core
    full_blocks = rows // block_rows          # blocks whose rows are all valid
    any_masked = scheduled > full_blocks

    if scheduled == blocks_total:
        def in_map(c, i):
            return (c * blocks_per_core + i, 0)
    else:
        # At most one over-scheduled block: clamp its DMA back onto the last
        # valid block (its contribution is masked to zero in-kernel), so no
        # fully out-of-bounds block copy is ever issued.
        def in_map(c, i):
            return (jnp.minimum(c * blocks_per_core + i, blocks_total - 1), 0)

    out_rows = num_core_groups * _SUBLANES

    part_d, part_d2 = pl.pallas_call(
        _make_sie_kernel(rows, block_rows, blocks_per_core, full_blocks, any_masked),
        out_shape=(
            jax.ShapeDtypeStruct((out_rows, _LANES), jnp.float32),
            jax.ShapeDtypeStruct((out_rows, _LANES), jnp.float32),
        ),
        grid_spec=pltpu.PrefetchScalarGridSpec(
            num_scalar_prefetch=0,
            grid=(num_core_groups, blocks_per_core),
            in_specs=[
                pl.BlockSpec((block_rows, _LANES), in_map),
                pl.BlockSpec((block_rows, _LANES), in_map),
            ],
            out_specs=[
                pl.BlockSpec((_SUBLANES, _LANES), lambda c, i: (c, 0)),
                pl.BlockSpec((_SUBLANES, _LANES), lambda c, i: (c, 0)),
            ],
        ),
        compiler_params=pltpu.CompilerParams(
            dimension_semantics=("parallel", "arbitrary"),
            vmem_limit_bytes=_VMEM_LIMIT_BYTES,
        ),
    )(yt2d, yp2d)
    return jnp.sum(part_d), jnp.sum(part_d2)


def scale_invariant_error(y_true, y_pred, lamada=LAMADA):
    assert y_true.shape == y_pred.shape
    n_elems = y_true.size
    n = jnp.float32(n_elems)

    flat_t = y_true.reshape(-1)
    flat_p = y_pred.reshape(-1)
    n_full = (n_elems // _LANES) * _LANES

    sum_d = jnp.float32(0.0)
    sum_d2 = jnp.float32(0.0)

    if n_full > 0:
        def prep(flat):
            if n_full != n_elems:
                # TODO(synk): XLA materializes this prefix slice once; a
                # 1-D-blockspec masked kernel could avoid even that copy.
                flat = jax.lax.slice(flat, (0,), (n_full,))
            return flat.reshape(n_full // _LANES, _LANES)

        kd, kd2 = _partial_sums(prep(flat_t), prep(flat_p))
        sum_d = sum_d + kd
        sum_d2 = sum_d2 + kd2

    if n_full != n_elems:
        # <=127 trailing elements: plain jnp glue, negligible work.
        tt = jnp.clip(flat_t[n_full:].astype(jnp.float32), CLAMP_MIN, CLAMP_MAX)
        tp = jnp.clip(flat_p[n_full:].astype(jnp.float32), CLAMP_MIN, CLAMP_MAX)
        dt = jnp.log(tp) - jnp.log(tt)
        sum_d = sum_d + jnp.sum(dt)
        sum_d2 = sum_d2 + jnp.sum(dt * dt)

    mean_d = sum_d / n
    mean_d2 = sum_d2 / n
    return mean_d2 - lamada * mean_d * mean_d


def _reference(y_true, y_pred, lamada=LAMADA):
    d = jnp.log(jnp.clip(y_pred, CLAMP_MIN, CLAMP_MAX)) - jnp.log(
        jnp.clip(y_true, CLAMP_MIN, CLAMP_MAX)
    )
    return jnp.mean(d * d) - lamada * jnp.mean(d) * jnp.mean(d)


if __name__ == "__main__":
    key = jax.random.PRNGKey(0)
    k1, k2 = jax.random.split(key)
    # Depth-like positive inputs, NCHW layout (B=2, C=4, H=16, W=16).
    y_true = jax.random.uniform(k1, (2, 4, 16, 16), jnp.float32, 0.1, 10.0)
    y_pred = jax.random.uniform(k2, (2, 4, 16, 16), jnp.float32, 0.1, 10.0)

    loss = scale_invariant_error(y_true, y_pred)
    loss = jax.block_until_ready(loss)

    ref = _reference(y_true, y_pred)
    assert jnp.allclose(loss, ref, rtol=1e-5, atol=1e-5), (loss, ref)
    print("KERNEL_OK")
</pallas_src>

<mosaic_0001>
module attributes {stable_mosaic.version = 11 : i64} {
  func.func @kernel(%arg0: i32, %arg1: i32, %arg2: memref<16x128xf32, #tpu.memory_space<vmem>>, %arg3: memref<16x128xf32, #tpu.memory_space<vmem>>, %arg4: memref<8x128xf32, #tpu.memory_space<vmem>>, %arg5: memref<8x128xf32, #tpu.memory_space<vmem>>) attributes {dimension_semantics = [#tpu.dimension_semantics<parallel>, #tpu.dimension_semantics<arbitrary>], iteration_bounds = array<i64: 1, 1>, scalar_prefetch = 0 : i64, scratch_operands = 0 : i64, tpu.core_type = #tpu.core_type<tc>, window_params = [{transform_indices = @transform_0, window_bounds = array<i64: 16, 128>}, {transform_indices = @transform_1, window_bounds = array<i64: 16, 128>}, {transform_indices = @transform_2, window_bounds = array<i64: 8, 128>}, {transform_indices = @transform_3, window_bounds = array<i64: 8, 128>}]} {
    %c0_i32 = arith.constant 0 : i32
    %0 = arith.cmpi eq, %arg1, %c0_i32 : i32
    %1 = arith.extui %0 : i1 to i32
    %c0_i32_0 = arith.constant 0 : i32
    %2 = arith.cmpi ne, %1, %c0_i32_0 : i32
    scf.if %2 {
      %cst_17 = arith.constant 0.000000e+00 : f32
      %27 = vector.broadcast %cst_17 : f32 to vector<8x128xf32>
      %c0_18 = arith.constant 0 : index
      %c0_19 = arith.constant 0 : index
      %28 = vector.load %arg4[%c0_18, %c0_19] : memref<8x128xf32, #tpu.memory_space<vmem>>, vector<8x128xf32>
      tpu.vector_store %arg4[%c0_18, %c0_19], %27 {strides = array<i32>} : memref<8x128xf32, #tpu.memory_space<vmem>>, vector<8x128xf32>,
      %cst_20 = arith.constant 0.000000e+00 : f32
      %29 = vector.broadcast %cst_20 : f32 to vector<8x128xf32>
      %c0_21 = arith.constant 0 : index
      %c0_22 = arith.constant 0 : index
      %30 = vector.load %arg5[%c0_21, %c0_22] : memref<8x128xf32, #tpu.memory_space<vmem>>, vector<8x128xf32>
      tpu.vector_store %arg5[%c0_21, %c0_22], %29 {strides = array<i32>} : memref<8x128xf32, #tpu.memory_space<vmem>>, vector<8x128xf32>,
    } else {
    }
    %c0 = arith.constant 0 : index
    %c0_1 = arith.constant 0 : index
    %3 = vector.load %arg2[%c0, %c0_1] : memref<16x128xf32, #tpu.memory_space<vmem>>, vector<16x128xf32>
    %cst = arith.constant 9.99999993E-9 : f32
    %cst_2 = arith.constant 1.000000e+08 : f32
    %4 = vector.broadcast %cst : f32 to vector<16x128xf32>
    %5 = arith.maximumf %4, %3 : vector<16x128xf32>
    %6 = vector.broadcast %cst_2 : f32 to vector<16x128xf32>
    %7 = arith.minimumf %6, %5 : vector<16x128xf32>
    %c0_3 = arith.constant 0 : index
    %c0_4 = arith.constant 0 : index
    %8 = vector.load %arg3[%c0_3, %c0_4] : memref<16x128xf32, #tpu.memory_space<vmem>>, vector<16x128xf32>
    %cst_5 = arith.constant 9.99999993E-9 : f32
    %cst_6 = arith.constant 1.000000e+08 : f32
    %9 = vector.broadcast %cst_5 : f32 to vector<16x128xf32>
    %10 = arith.maximumf %9, %8 : vector<16x128xf32>
    %11 = vector.broadcast %cst_6 : f32 to vector<16x128xf32>
    %12 = arith.minimumf %11, %10 : vector<16x128xf32>
    %13 = math.log %12 : vector<16x128xf32>
    %14 = math.log %7 : vector<16x128xf32>
    %15 = arith.subf %13, %14 : vector<16x128xf32>
    %c0_7 = arith.constant 0 : index
    %c0_8 = arith.constant 0 : index
    %16 = vector.load %arg4[%c0_7, %c0_8] : memref<8x128xf32, #tpu.memory_space<vmem>>, vector<8x128xf32>
    %17 = vector.shape_cast %15 : vector<16x128xf32> to vector<2x8x128xf32>
    %cst_9 = arith.constant dense<0.000000e+00> : vector<8x128xf32>
    %18 = vector.multi_reduction <add>, %17, %cst_9 [0] : vector<2x8x128xf32> to vector<8x128xf32>
    %19 = arith.addf %16, %18 : vector<8x128xf32>
    %c0_10 = arith.constant 0 : index
    %c0_11 = arith.constant 0 : index
    %20 = vector.load %arg4[%c0_10, %c0_11] : memref<8x128xf32, #tpu.memory_space<vmem>>, vector<8x128xf32>
    tpu.vector_store %arg4[%c0_10, %c0_11], %19 {strides = array<i32>} : memref<8x128xf32, #tpu.memory_space<vmem>>, vector<8x128xf32>,
    %c0_12 = arith.constant 0 : index
    %c0_13 = arith.constant 0 : index
    %21 = vector.load %arg5[%c0_12, %c0_13] : memref<8x128xf32, #tpu.memory_space<vmem>>, vector<8x128xf32>
    %22 = arith.mulf %15, %15 : vector<16x128xf32>
    %23 = vector.shape_cast %22 : vector<16x128xf32> to vector<2x8x128xf32>
    %cst_14 = arith.constant dense<0.000000e+00> : vector<8x128xf32>
    %24 = vector.multi_reduction <add>, %23, %cst_14 [0] : vector<2x8x128xf32> to vector<8x128xf32>
    %25 = arith.addf %21, %24 : vector<8x128xf32>
    %c0_15 = arith.constant 0 : index
    %c0_16 = arith.constant 0 : index
    %26 = vector.load %arg5[%c0_15, %c0_16] : memref<8x128xf32, #tpu.memory_space<vmem>>, vector<8x128xf32>
    tpu.vector_store %arg5[%c0_15, %c0_16], %25 {strides = array<i32>} : memref<8x128xf32, #tpu.memory_space<vmem>>, vector<8x128xf32>,
    return
  }
  func.func @transform_0(%arg0: i32, %arg1: i32) -> (i32, i32) {
    %c1_i32 = arith.constant 1 : i32
    %0 = arith.muli %arg0, %c1_i32 : i32
    %1 = arith.addi %0, %arg1 : i32
    %c0_i32 = arith.constant 0 : i32
    %c0_i32_0 = arith.constant 0 : i32
    return %1, %c0_i32 : i32, i32
  }
  func.func @transform_1(%arg0: i32, %arg1: i32) -> (i32, i32) {
    %c1_i32 = arith.constant 1 : i32
    %0 = arith.muli %arg0, %c1_i32 : i32
    %1 = arith.addi %0, %arg1 : i32
    %c0_i32 = arith.constant 0 : i32
    %c0_i32_0 = arith.constant 0 : i32
    return %1, %c0_i32 : i32, i32
  }
  func.func @transform_2(%arg0: i32, %arg1: i32) -> (i32, i32) {
    %c0_i32 = arith.constant 0 : i32
    %c0_i32_0 = arith.constant 0 : i32
    return %arg0, %c0_i32 : i32, i32
  }
  func.func @transform_3(%arg0: i32, %arg1: i32) -> (i32, i32) {
    %c0_i32 = arith.constant 0 : i32
    %c0_i32_0 = arith.constant 0 : i32
    return %arg0, %c0_i32 : i32, i32
  }
}

</mosaic_0001>

<bundles_post_ra>
// kernel: tpu_custom_call.1
= control target key start
LH: loop header
LB: loop body
LE: loop exit
PB: predicated region body
PF: predicated region fallthrough
CT: control target
= control target key end

     0   :  { %9 = vsyncpa [#allocation3], 0  ;;  %s308_s0 = inlined_call_operand.hbm [shape: f32[16,128], index: 0, kind: input, shape index: {}]   ;;  %s309_s1 = inlined_call_operand.hbm [shape: f32[16,128], index: 1, kind: input, shape index: {}]   ;;  %s310_s2 = inlined_call_operand.hbm [shape: f32[8,128], index: 2, kind: output, shape index: {0}]   ;;  %s311_s3 = inlined_call_operand.hbm [shape: f32[8,128], index: 3, kind: output, shape index: {1}]  }
   0x1   :  { %10 = vsyncpa [#allocation6], 0 }
   0x2   :  { %11 = vsyncpa [#allocation4], 0 }
   0x3   :  { %12 = vsyncpa [#allocation9], 0  ;;  %s234_s12 = smov [#allocation2]   ;;  %s138_s16 = scalar_lea.hbm %s308_s0, 256 }
   0x4   :  { %s22_s13 = sshll.u32 %s234_s12, 4  ;;  %p139_p0 = scmp.ne.s32.totalorder %s308_s0, %s138_s16  ;;  %s23_s13 = int_to_ptr.vmem [resolvable:$true] %s22_s13 }
   0x5   :  { %p142_p1 = scmp.lt.u32.totalorder %s138_s16, %s308_s0 }
   0x7   :  { %p144_p2 = pnand %p142_p1, %p139_p0 }
   0x9   :  { %147 = shalt.err (!%p144_p2)
}
   0xa   :  { %s148_s21 = scalar_lea.vmem %s23_s13, 256  ;;  %p153_p4 = scmp.lt.s32.totalorder %s23_s13, %s23_s13 }
   0xb   :  { %p149_p3 = scmp.ne.s32.totalorder %s23_s13, %s148_s21  ;;  %p154_p5 = scmp.lt.s32.totalorder %s148_s21, %s148_s21 }
   0xd   :  { %p155_p6 = por %p154_p5, %p153_p4 }
   0xf   :  { %p156_p7 = pnand %p155_p6, %p149_p3 }
  0x11   :  { %159 = shalt.err (!%p156_p7)
}
  0x12   :  { %s235_s22 = smov 128   ;;  %s236_s23 = smov 8  }
  0x13   :  { %28 = dma.hbm_to_vmem [thread:$0]  %s308_s0, 256, %s23_s13, [#allocation3], %s235_s22, %s235_s22, %s236_s23  }
  0x14   :  { %s237_s26 = smov [#allocation5]   ;;  %s160_s30 = scalar_lea.hbm %s309_s1, 256 }
  0x15   :  { %s38_s27 = sshll.u32 %s237_s26, 4  ;;  %p161_p8 = scmp.ne.s32.totalorder %s309_s1, %s160_s30  ;;  %s39_s27 = int_to_ptr.vmem [resolvable:$true] %s38_s27 }
  0x16   :  { %p164_p9 = scmp.lt.u32.totalorder %s160_s30, %s309_s1 }
  0x18   :  { %p166_p10 = pnand %p164_p9, %p161_p8 }
  0x1a   :  { %169 = shalt.err (!%p166_p10)
}
  0x1b   :  { %s170_s8 = scalar_lea.vmem %s39_s27, 256  ;;  %p175_p12 = scmp.lt.s32.totalorder %s39_s27, %s39_s27 }
  0x1c   :  { %p171_p11 = scmp.ne.s32.totalorder %s39_s27, %s170_s8  ;;  %p176_p13 = scmp.lt.s32.totalorder %s170_s8, %s170_s8 }
  0x1e   :  { %p177_p0 = por %p176_p13, %p175_p12 }
  0x20   :  { %p178_p1 = pnand %p177_p0, %p171_p11 }
  0x22   :  { %181 = shalt.err (!%p178_p1)
}
  0x23   :  { %44 = dma.hbm_to_vmem [thread:$0]  %s309_s1, 256, %s39_s27, [#allocation6], %s235_s22, %s235_s22, %s236_s23  }
  0x24   :  { %226 = dma.done.wait [#allocation3], 256  }
  0x25   :  { %227 = vsyncadd [#allocation3], 4294967040 }
  0x26   :  { %228 = dma.done.wait [#allocation6], 256  }
  0x27   :  { %229 = vsyncadd [#allocation6], 4294967040  ;;  %v61_v0 = vld [vmem:[#allocation2] sm:$0xff]  ;;  %v62_v1 = vld [vmem:[#allocation2 + $0x8] sm:$0xff]  ;;  %s238_s1 = smov [#allocation7]   ;;  %s239_s11 = smov [#allocation8]  }
  0x28   :  { %v67_v2 = vld [vmem:[#allocation5] sm:$0xff]  ;;  %v63_v3 = vmax.f32 %v61_v0, 1e-08  ;;  %v64_v4 = vmax.f32 %v62_v1, 1e-08  ;;  %v68_v5 = vld [vmem:[#allocation5 + $0x8] sm:$0xff] }
  0x29   :  { %v69_v6 = vmax.f32 %v67_v2, 1e-08  ;;  %v70_v7 = vmax.f32 %v68_v5, 1e-08  ;;  %s99_s10 = sshll.u32 %s238_s1, 4  ;;  %s109_s12 = sshll.u32 %s239_s11, 4  ;;  %s100_s10 = int_to_ptr.vmem [resolvable:$true] %s99_s10  ;;  %s110_s12 = int_to_ptr.vmem [resolvable:$true] %s109_s12 }
  0x2a   :  { %v65_v8 = vmin.f32 %v63_v3, 1e+08  ;;  %v66_v9 = vmin.f32 %v64_v4, 1e+08  ;;  %s182_s13 = scalar_lea.vmem %s100_s10, 128  ;;  %p187_p3 = scmp.lt.s32.totalorder %s100_s10, %s100_s10 }
  0x2b   :  { %v71_v10 = vmin.f32 %v69_v6, 1e+08  ;;  %v72_v11 = vmin.f32 %v70_v7, 1e+08  ;;  %p183_p2 = scmp.ne.s32.totalorder %s100_s10, %s182_s13  ;;  %p188_p4 = scmp.lt.s32.totalorder %s182_s13, %s182_s13 }
  0x2c   :  { %130 = vlog2.f32 %v65_v8 }
  0x2d   :  { %132 = vlog2.f32 %v71_v10  ;;  %p189_p5 = por %p188_p4, %p187_p3 }
  0x2e   :  { %134 = vlog2.f32 %v72_v11 }
  0x2f   :  { %136 = vlog2.f32 %v66_v9  ;;  %p190_p6 = pnand %p189_p5, %p183_p2 }
  0x36   :  { %v131_v12 = vpop.eup %130 }
  0x37   :  { %v133_v13 = vpop.eup %132  ;;  %v78_v14 = vmul.f32 0.6931472, %v131_v12 }
  0x38   :  { %v135_v15 = vpop.eup %134  ;;  %v74_v16 = vmul.f32 0.6931472, %v133_v13 }
  0x39   :  { %v137_v17 = vpop.eup %136  ;;  %v76_v18 = vmul.f32 0.6931472, %v135_v15 }
  0x3a   :  { %v80_v19 = vmul.f32 0.6931472, %v137_v17  ;;  %v81_v20 = vsub.f32 %v74_v16, %v78_v14 }
  0x3c   :  { %v82_v21 = vsub.f32 %v76_v18, %v80_v19  ;;  %v88_v22 = vmul.f32 %v81_v20, %v81_v20 }
  0x3e   :  { %v84_v23 = vadd.f32 %v82_v21, %v81_v20  ;;  %v89_v24 = vmul.f32 %v82_v21, %v82_v21 }
  0x40   :  { %v90_v25 = vadd.f32 %v89_v24, %v88_v22  ;;  %86 = vst [vmem:[#allocation7] sm:$0xff] %v84_v23 }
  0x41   :  { %193 = shalt.err (!%p190_p6)
}
  0x42   :  { %s194_s16 = scalar_lea.hbm %s310_s2, 128 }
  0x43   :  { %p195_p7 = scmp.ne.s32.totalorder %s310_s2, %s194_s16  ;;  %p198_p8 = scmp.lt.u32.totalorder %s194_s16, %s310_s2 }
  0x45   :  { %p200_p9 = pnand %p198_p8, %p195_p7 }
  0x47   :  { %203 = shalt.err (!%p200_p9)
}
  0x48   :  { %102 = dma.vmem_to_hbm [thread:$0]  %s100_s10, 128, %s310_s2, [#allocation4]   ;;  %92 = vst [vmem:[#allocation8] sm:$0xff] %v90_v25 }
  0x49   :  { %s204_s23 = scalar_lea.vmem %s110_s12, 128  ;;  %p209_p11 = scmp.lt.s32.totalorder %s110_s12, %s110_s12 }
  0x4a   :  { %p205_p10 = scmp.ne.s32.totalorder %s110_s12, %s204_s23  ;;  %p210_p12 = scmp.lt.s32.totalorder %s204_s23, %s204_s23 }
  0x4c   :  { %p211_p13 = por %p210_p12, %p209_p11 }
  0x4e   :  { %p212_p0 = pnand %p211_p13, %p205_p10 }
  0x50   :  { %215 = shalt.err (!%p212_p0)
}
  0x51   :  { %s216_s26 = scalar_lea.hbm %s311_s3, 128 }
  0x52   :  { %p217_p1 = scmp.ne.s32.totalorder %s311_s3, %s216_s26  ;;  %p220_p2 = scmp.lt.u32.totalorder %s216_s26, %s311_s3 }
  0x54   :  { %p222_p3 = pnand %p220_p2, %p217_p1 }
  0x56   :  { %225 = shalt.err (!%p222_p3)
}
  0x57   :  { %112 = dma.vmem_to_hbm [thread:$0]  %s110_s12, 128, %s311_s3, [#allocation9]  }
  0x58   :  { %230 = dma.done.wait [#allocation4], 128  }
  0x59   :  { %231 = vsyncadd [#allocation4], 4294967168 }
  0x5a   :  { %232 = dma.done.wait [#allocation9], 128  }
  0x5b   :  { %233 = vsyncadd [#allocation9], 4294967168 }
  0x5c   :  { %119 = vsyncpa [#allocation3], 1 }
  0x5d   :  { %120 = vsyncpa [#allocation6], 1 }
  0x5e   :  { %121 = vsyncpa [#allocation4], 1 }
  0x5f   :  { %122 = vsyncpa [#allocation9], 1 }

</bundles_post_ra>
